<compile_context>
chip_gen: v7x
topology: tpu7x:2x2x1
jax: 0.10.0
libtpu: 0.0.40
codegen_flags: <defaults>
</compile_context>

<pallas_src>
import functools

import jax
import jax.numpy as jnp
from jax.experimental import pallas as pl
from jax.experimental.pallas import tpu as pltpu

EPS = 1e-5
_PAD = 16   # bf16-tile-aligned offset of the activation inside the row-shift scratch


# ---------------------------------------------------------------------------
# Fused Pallas kernel: stem 1x1 conv + BN + ReLU, then the full ResBlock2d.
# ---------------------------------------------------------------------------
def _fused_resconv_kernel(x_ref, w0_ref, w1_ref, w2_ref, bn_ref, o_ref, pad_ref,
                          *, H, W):
    NH, L = o_ref.shape
    C = L // W                      # out_channels; lane index = w*C + c
    f32, bf16 = jnp.float32, jnp.bfloat16

    # (NH, 1) image-row masks: do the +/-1 vertical taps stay inside the image?
    h_ids = jax.lax.broadcasted_iota(jnp.int32, (NH, 1), 0) % H
    m_up = h_ids >= 1               # input row h-1 exists
    m_dn = h_ids <= H - 2           # input row h+1 exists

    def channel_stats(y):
        # Single pass: per-lane sum and sum-of-squares, stacked so one roll-reduce
        # chain averages both over the W lane groups (lanes of the same channel are
        # C apart).  Stays exact in f32; no MXU involved.
        s = jnp.concatenate([jnp.sum(y, axis=0, keepdims=True),
                             jnp.sum(y * y, axis=0, keepdims=True)], axis=0)  # (2, L)
        sh = C
        while sh < L:               # log2(W) static steps (W is a power of two)
            s = s + pltpu.roll(s, shift=sh, axis=1)
            sh *= 2
        s = s * (1.0 / (NH * W))
        mu = s[0:1, :]
        var = s[1:2, :] - mu * mu   # biased variance (PyTorch train-mode BN)
        return mu, var

    def bn_affine(y, g, b):
        mu, var = channel_stats(y)
        sc = g * jax.lax.rsqrt(var + EPS)
        return y * sc + (b - mu * sc)

    def conv3x3(a_bf, w_ref):
        # 3x3 "same" conv as ONE MXU matmul with K = 3L.  Horizontal taps + width
        # padding are folded into the (3L, L) weight; vertical taps come from the
        # lane-concat [row h-1 | row h | row h+1].  The mid third is the in-register
        # activation; only the shifted thirds read the bf16 scratch, and their
        # out-of-image rows are zeroed BEFORE the matmul (taps accumulate in the MXU).
        pad_ref[_PAD:_PAD + NH, :] = a_bf                              # one aligned bf16 store
        up = jnp.where(m_up, pad_ref[_PAD - 1:_PAD - 1 + NH, :], 0)    # halo/stale rows discarded here
        dn = jnp.where(m_dn, pad_ref[_PAD + 1:_PAD + 1 + NH, :], 0)
        big = jnp.concatenate([up, a_bf, dn], axis=1)                  # (NH, 3L) bf16
        return jnp.dot(big, w_ref[...], preferred_element_type=f32)

    g0, b0 = bn_ref[0:1, :], bn_ref[1:2, :]
    g1, b1 = bn_ref[2:3, :], bn_ref[3:4, :]
    g2, b2 = bn_ref[4:5, :], bn_ref[5:6, :]

    # ---- stage 0: 1x1 conv (block-diagonal matmul) + BN + ReLU ----
    y0 = jnp.dot(x_ref[...], w0_ref[...], preferred_element_type=f32)
    a0 = jnp.maximum(bn_affine(y0, g0, b0), 0.0)
    a0_bf = a0.astype(bf16)                       # single cast, reused for store + mid tap

    # ---- stage 1: resblock cnn1 (3x3) + BN + ReLU ----
    a1 = jnp.maximum(bn_affine(conv3x3(a0_bf, w1_ref), g1, b1), 0.0)

    # ---- stage 2: resblock cnn2 (3x3) + BN + residual + ReLU ----
    z2 = bn_affine(conv3x3(a1.astype(bf16), w2_ref), g2, b2) + a0
    o_ref[...] = jnp.maximum(z2, 0.0).astype(o_ref.dtype)


def _fused_call(x_slab, w0m, w1m, w2m, bn_pack, *, H, W):
    assert W & (W - 1) == 0, "lane roll-reduce assumes W is a power of two"
    NH = x_slab.shape[0]
    L = w0m.shape[1]
    vmem = lambda: pl.BlockSpec(memory_space=pltpu.MemorySpace.VMEM)
    return pl.pallas_call(
        functools.partial(_fused_resconv_kernel, H=H, W=W),
        out_shape=jax.ShapeDtypeStruct((NH, L), jnp.float32),
        in_specs=[vmem() for _ in range(5)],
        out_specs=vmem(),
        scratch_shapes=[pltpu.VMEM((NH + 2 * _PAD, L), jnp.bfloat16)],
    )(x_slab, w0m, w1m, w2m, bn_pack)


# ---------------------------------------------------------------------------
# Parameter construction (PyTorch-default init) and one-time layout transforms.
# ---------------------------------------------------------------------------
def make_params(key, in_c, out_c, ks=3):
    """Deterministic init matching PyTorch Conv2d defaults (uniform +/- 1/sqrt(fan_in))."""
    def conv_init(k, cout, cin, kh, kw):
        kw_, kb_ = jax.random.split(k)
        bound = float((cin * kh * kw) ** -0.5)
        w = jax.random.uniform(kw_, (cout, cin, kh, kw), jnp.float32, -bound, bound)
        b = jax.random.uniform(kb_, (cout,), jnp.float32, -bound, bound)
        return w, b

    k0, k1, k2 = jax.random.split(key, 3)
    w0, b0 = conv_init(k0, out_c, in_c, 1, 1)          # ResConv2d.conv (1x1)
    w1, b1 = conv_init(k1, out_c, out_c, ks, ks)       # ResBlock2d.cnn1
    w2, b2 = conv_init(k2, out_c, out_c, ks, ks)       # ResBlock2d.cnn2
    ones = jnp.ones((out_c,), jnp.float32)
    zeros = jnp.zeros((out_c,), jnp.float32)
    return dict(w0=w0, b0=b0, w1=w1, b1=b1, w2=w2, b2=b2,
                g0=ones, be0=zeros, g1=ones, be1=zeros, g2=ones, be2=zeros)


def prepare_params(p, W):
    """One-time weight/param layout transforms, hoisted out of the forward path."""
    f32 = jnp.float32
    eye_w = jnp.eye(W, dtype=f32)

    # 1x1 conv -> block-diagonal (W*Cin, W*Cout) matrix in the slab lane layout.
    w0m = jnp.kron(eye_w, p["w0"][:, :, 0, 0].T.astype(f32))

    def tridiag_concat(wk):
        """3x3 conv -> ONE (3*W*C, W*C) matrix: per-vertical-tap block-tridiagonal
        matrices (horizontal taps + padding folded via shifted identities),
        concatenated along K in [h-1, h, h+1] order to match the kernel's lane-concat."""
        c_out, c_in = wk.shape[0], wk.shape[1]
        taps = []
        for kh in range(3):
            m = jnp.zeros((W * c_in, W * c_out), f32)
            for kw in range(3):
                shift = jnp.eye(W, k=1 - kw, dtype=f32)   # input col = out col + (kw - 1)
                m = m + jnp.kron(shift, wk[:, :, kh, kw].T.astype(f32))
            taps.append(m)
        return jnp.concatenate(taps, axis=0)              # (3*W*C, W*C)

    w1m = tridiag_concat(p["w1"])
    w2m = tridiag_concat(p["w2"])

    # Six per-channel BN vectors, tiled to the (w*C + c) lane layout, packed (6, W*C).
    bn_pack = jnp.stack([jnp.tile(p["g0"], W), jnp.tile(p["be0"], W),
                         jnp.tile(p["g1"], W), jnp.tile(p["be1"], W),
                         jnp.tile(p["g2"], W), jnp.tile(p["be2"], W)]).astype(f32)

    return dict(w0m=w0m.astype(jnp.bfloat16),
                w1m=w1m.astype(jnp.bfloat16),
                w2m=w2m.astype(jnp.bfloat16),
                bn=bn_pack)


# ---------------------------------------------------------------------------
# Forward pass (layout glue + one fused kernel launch).
# ---------------------------------------------------------------------------
def resconv2d_forward(x_nchw, pp):
    # TODO(synk): the NCHW<->slab relayout below runs as separate XLA ops (flagged by
    # the perf review); accepting/producing the slab layout at the module boundary
    # would remove them, but the module contract is NCHW so it is kept here.
    N, Cin, H, W = x_nchw.shape
    L = pp["bn"].shape[1]
    Cout = L // W
    NH = N * H
    x_slab = jnp.transpose(x_nchw, (0, 2, 3, 1)).reshape(NH, W * Cin).astype(jnp.bfloat16)
    out_slab = _fused_call(x_slab, pp["w0m"], pp["w1m"], pp["w2m"], pp["bn"], H=H, W=W)
    return jnp.transpose(out_slab.reshape(N, H, W, Cout), (0, 3, 1, 2))   # back to NCHW


# ---------------------------------------------------------------------------
# Pure-JAX f32 reference (mirrors the PyTorch module in train mode) for self-check.
# ---------------------------------------------------------------------------
def reference_forward(x, p):
    def conv(x, w, b, pad):
        y = jax.lax.conv_general_dilated(x, w, (1, 1), [(pad, pad), (pad, pad)],
                                         dimension_numbers=("NCHW", "OIHW", "NCHW"))
        return y + b[None, :, None, None]

    def bn(y, g, be):
        mu = jnp.mean(y, axis=(0, 2, 3), keepdims=True)
        var = jnp.mean((y - mu) ** 2, axis=(0, 2, 3), keepdims=True)   # biased
        return (y - mu) * jax.lax.rsqrt(var + EPS) * g[None, :, None, None] \
               + be[None, :, None, None]

    a0 = jax.nn.relu(bn(conv(x, p["w0"], p["b0"], 0), p["g0"], p["be0"]))
    a1 = jax.nn.relu(bn(conv(a0, p["w1"], p["b1"], 1), p["g1"], p["be1"]))
    z2 = bn(conv(a1, p["w2"], p["b2"], 1), p["g2"], p["be2"]) + a0
    return jax.nn.relu(z2)


if __name__ == "__main__":
    key = jax.random.PRNGKey(0)
    k_x, k_p = jax.random.split(key)

    N, Cin, Cout, H, W = 2, 4, 8, 16, 16          # ResConv2d(4, 8, kernel_size=3, padding=1)
    x = jax.random.normal(k_x, (N, Cin, H, W), jnp.float32)

    params = make_params(k_p, Cin, Cout, ks=3)
    prepped = prepare_params(params, W)           # hoisted, one-time layout transforms

    fwd = jax.jit(resconv2d_forward)
    out = jax.block_until_ready(fwd(x, prepped))
    ref = jax.block_until_ready(jax.jit(reference_forward)(x, params))

    assert out.shape == (N, Cout, H, W)
    assert bool(jnp.isfinite(out).all())
    assert bool((out >= 0.0).all())               # final ReLU
    max_err = float(jnp.max(jnp.abs(out - ref)))
    assert max_err < 0.15, f"parity vs f32 reference failed: max abs err {max_err}"
    print("KERNEL_OK")
</pallas_src>

<mosaic_0001>
module attributes {stable_mosaic.version = 11 : i64} {
  func.func @_fused_resconv_kernel(%arg0: memref<32x64xbf16, #tpu.memory_space<vmem>>, %arg1: memref<64x128xbf16, #tpu.memory_space<vmem>>, %arg2: memref<384x128xbf16, #tpu.memory_space<vmem>>, %arg3: memref<384x128xbf16, #tpu.memory_space<vmem>>, %arg4: memref<6x128xf32, #tpu.memory_space<vmem>>, %arg5: memref<32x128xf32, #tpu.memory_space<vmem>>, %arg6: memref<64x128xbf16, #tpu.memory_space<vmem>>) attributes {dimension_semantics = [], scalar_prefetch = 0 : i64, scratch_operands = 1 : i64, tpu.core_type = #tpu.core_type<tc>} {
    %0 = tpu.iota {dimensions = array<i32: 0>} : vector<32x1xi32>
    %c16_i32 = arith.constant 16 : i32
    %c0_i32 = arith.constant 0 : i32
    %1 = arith.cmpi eq, %c16_i32, %c0_i32 : i32
    %c1_i32 = arith.constant 1 : i32
    %2 = arith.select %1, %c1_i32, %c16_i32 : i32
    %3 = vector.broadcast %2 : i32 to vector<32x1xi32>
    %4 = arith.remsi %0, %3 : vector<32x1xi32>
    %c0_i32_0 = arith.constant 0 : i32
    %5 = vector.broadcast %c0_i32_0 : i32 to vector<32x1xi32>
    %6 = arith.cmpi ne, %4, %5 : vector<32x1xi32>
    %c0_i32_1 = arith.constant 0 : i32
    %7 = vector.broadcast %c0_i32_1 : i32 to vector<32x1xi32>
    %8 = arith.cmpi slt, %4, %7 : vector<32x1xi32>
    %c0_i32_2 = arith.constant 0 : i32
    %9 = arith.cmpi slt, %2, %c0_i32_2 : i32
    %10 = vector.broadcast %9 : i1 to vector<32x1xi1>
    %11 = vector.broadcast %10 : vector<32x1xi1> to vector<32x1xi1>
    %12 = arith.xori %8, %11 : vector<32x1xi1>
    %13 = arith.andi %12, %6 : vector<32x1xi1>
    %14 = vector.broadcast %2 : i32 to vector<32x1xi32>
    %15 = arith.addi %4, %14 : vector<32x1xi32>
    %16 = arith.select %13, %15, %4 : vector<32x1xi1>, vector<32x1xi32>
    %c1_i32_3 = arith.constant 1 : i32
    %17 = vector.broadcast %c1_i32_3 : i32 to vector<32x1xi32>
    %18 = arith.cmpi sge, %16, %17 : vector<32x1xi32>
    %c14_i32 = arith.constant 14 : i32
    %19 = vector.broadcast %c14_i32 : i32 to vector<32x1xi32>
    %20 = arith.cmpi sle, %16, %19 : vector<32x1xi32>
    %c0 = arith.constant 0 : index
    %c0_4 = arith.constant 0 : index
    %21 = vector.load %arg4[%c0, %c0_4] : memref<6x128xf32, #tpu.memory_space<vmem>>, vector<1x128xf32>
    %c1 = arith.constant 1 : index
    %c0_5 = arith.constant 0 : index
    %22 = vector.load %arg4[%c1, %c0_5] : memref<6x128xf32, #tpu.memory_space<vmem>>, vector<1x128xf32>
    %c2 = arith.constant 2 : index
    %c0_6 = arith.constant 0 : index
    %23 = vector.load %arg4[%c2, %c0_6] : memref<6x128xf32, #tpu.memory_space<vmem>>, vector<1x128xf32>
    %c3 = arith.constant 3 : index
    %c0_7 = arith.constant 0 : index
    %24 = vector.load %arg4[%c3, %c0_7] : memref<6x128xf32, #tpu.memory_space<vmem>>, vector<1x128xf32>
    %c4 = arith.constant 4 : index
    %c0_8 = arith.constant 0 : index
    %25 = vector.load %arg4[%c4, %c0_8] : memref<6x128xf32, #tpu.memory_space<vmem>>, vector<1x128xf32>
    %c5 = arith.constant 5 : index
    %c0_9 = arith.constant 0 : index
    %26 = vector.load %arg4[%c5, %c0_9] : memref<6x128xf32, #tpu.memory_space<vmem>>, vector<1x128xf32>
    %c0_10 = arith.constant 0 : index
    %c0_11 = arith.constant 0 : index
    %27 = vector.load %arg0[%c0_10, %c0_11] : memref<32x64xbf16, #tpu.memory_space<vmem>>, vector<32x64xbf16>
    %c0_12 = arith.constant 0 : index
    %c0_13 = arith.constant 0 : index
    %28 = vector.load %arg1[%c0_12, %c0_13] : memref<64x128xbf16, #tpu.memory_space<vmem>>, vector<64x128xbf16>
    %cst = arith.constant dense<0.000000e+00> : vector<32x128xf32>
    %29 = tpu.matmul %27, %28, %cst {dimension_numbers = #tpu.dot_dimension_numbers<[1], [0], [0], [1], [0, 0, 1, 1], [], []>} : vector<32x64xbf16>, vector<64x128xbf16>, vector<32x128xf32> -> vector<32x128xf32>
    %cst_14 = arith.constant dense<0.000000e+00> : vector<128xf32>
    %30 = vector.multi_reduction <add>, %29, %cst_14 [0] : vector<32x128xf32> to vector<128xf32>
    %31 = vector.shape_cast %30 : vector<128xf32> to vector<1x128xf32>
    %32 = arith.mulf %29, %29 : vector<32x128xf32>
    %cst_15 = arith.constant dense<0.000000e+00> : vector<128xf32>
    %33 = vector.multi_reduction <add>, %32, %cst_15 [0] : vector<32x128xf32> to vector<128xf32>
    %34 = vector.shape_cast %33 : vector<128xf32> to vector<1x128xf32>
    %35 = tpu.concatenate %31, %34 in 0 : vector<1x128xf32>, vector<1x128xf32> -> vector<2x128xf32>
    %c8_i32 = arith.constant 8 : i32
    %36 = tpu.dynamic_rotate %35 by %c8_i32 dim 1 : vector<2x128xf32>, i32 -> vector<2x128xf32>
    %37 = arith.addf %35, %36 : vector<2x128xf32>
    %c16_i32_16 = arith.constant 16 : i32
    %38 = tpu.dynamic_rotate %37 by %c16_i32_16 dim 1 : vector<2x128xf32>, i32 -> vector<2x128xf32>
    %39 = arith.addf %37, %38 : vector<2x128xf32>
    %c32_i32 = arith.constant 32 : i32
    %40 = tpu.dynamic_rotate %39 by %c32_i32 dim 1 : vector<2x128xf32>, i32 -> vector<2x128xf32>
    %41 = arith.addf %39, %40 : vector<2x128xf32>
    %c64_i32 = arith.constant 64 : i32
    %42 = tpu.dynamic_rotate %41 by %c64_i32 dim 1 : vector<2x128xf32>, i32 -> vector<2x128xf32>
    %43 = arith.addf %41, %42 : vector<2x128xf32>
    %cst_17 = arith.constant 0.001953125 : f32
    %44 = vector.broadcast %cst_17 : f32 to vector<2x128xf32>
    %45 = arith.mulf %43, %44 : vector<2x128xf32>
    %46 = vector.extract_strided_slice %45 {offsets = [0, 0], sizes = [1, 128], strides = [1, 1]} : vector<2x128xf32> to vector<1x128xf32>
    %47 = vector.extract_strided_slice %45 {offsets = [1, 0], sizes = [1, 128], strides = [1, 1]} : vector<2x128xf32> to vector<1x128xf32>
    %48 = arith.mulf %46, %46 : vector<1x128xf32>
    %49 = arith.subf %47, %48 : vector<1x128xf32>
    %cst_18 = arith.constant 9.99999974E-6 : f32
    %50 = vector.broadcast %cst_18 : f32 to vector<1x128xf32>
    %51 = arith.addf %49, %50 : vector<1x128xf32>
    %52 = math.rsqrt %51 : vector<1x128xf32>
    %53 = arith.mulf %21, %52 : vector<1x128xf32>
    %54 = vector.broadcast %53 : vector<1x128xf32> to vector<32x128xf32>
    %55 = arith.mulf %29, %54 : vector<32x128xf32>
    %56 = arith.mulf %46, %53 : vector<1x128xf32>
    %57 = arith.subf %22, %56 : vector<1x128xf32>
    %58 = vector.broadcast %57 : vector<1x128xf32> to vector<32x128xf32>
    %59 = arith.addf %55, %58 : vector<32x128xf32>
    %cst_19 = arith.constant 0.000000e+00 : f32
    %60 = vector.broadcast %cst_19 : f32 to vector<32x128xf32>
    %61 = arith.maximumf %59, %60 : vector<32x128xf32>
    %62 = arith.truncf %61 : vector<32x128xf32> to vector<32x128xbf16>
    %c16 = arith.constant 16 : index
    %c0_20 = arith.constant 0 : index
    %63 = vector.load %arg6[%c16, %c0_20] : memref<64x128xbf16, #tpu.memory_space<vmem>>, vector<32x128xbf16>
    tpu.vector_store %arg6[%c16, %c0_20], %62 {strides = array<i32>} : memref<64x128xbf16, #tpu.memory_space<vmem>>, vector<32x128xbf16>,
    %c15 = arith.constant 15 : index
    %c0_21 = arith.constant 0 : index
    %64 = vector.load %arg6[%c15, %c0_21] : memref<64x128xbf16, #tpu.memory_space<vmem>>, vector<32x128xbf16>
    %c0_i32_22 = arith.constant 0 : i32
    %65 = arith.sitofp %c0_i32_22 : i32 to bf16
    %66 = vector.shape_cast %18 : vector<32x1xi1> to vector<32x1xi1>
    %67 = vector.broadcast %66 : vector<32x1xi1> to vector<32x128xi1>
    %68 = vector.broadcast %65 : bf16 to vector<32x128xbf16>
    %69 = arith.select %67, %64, %68 : vector<32x128xi1>, vector<32x128xbf16>
    %c17 = arith.constant 17 : index
    %c0_23 = arith.constant 0 : index
    %70 = vector.load %arg6[%c17, %c0_23] : memref<64x128xbf16, #tpu.memory_space<vmem>>, vector<32x128xbf16>
    %c0_i32_24 = arith.constant 0 : i32
    %71 = arith.sitofp %c0_i32_24 : i32 to bf16
    %72 = vector.shape_cast %20 : vector<32x1xi1> to vector<32x1xi1>
    %73 = vector.broadcast %72 : vector<32x1xi1> to vector<32x128xi1>
    %74 = vector.broadcast %71 : bf16 to vector<32x128xbf16>
    %75 = arith.select %73, %70, %74 : vector<32x128xi1>, vector<32x128xbf16>
    %76 = tpu.concatenate %69, %62, %75 in 1 : vector<32x128xbf16>, vector<32x128xbf16>, vector<32x128xbf16> -> vector<32x384xbf16>
    %c0_25 = arith.constant 0 : index
    %c0_26 = arith.constant 0 : index
    %77 = vector.load %arg2[%c0_25, %c0_26] : memref<384x128xbf16, #tpu.memory_space<vmem>>, vector<384x128xbf16>
    %cst_27 = arith.constant dense<0.000000e+00> : vector<32x128xf32>
    %78 = tpu.matmul %76, %77, %cst_27 {dimension_numbers = #tpu.dot_dimension_numbers<[1], [0], [0], [1], [0, 0, 1, 1], [], []>} : vector<32x384xbf16>, vector<384x128xbf16>, vector<32x128xf32> -> vector<32x128xf32>
    %cst_28 = arith.constant dense<0.000000e+00> : vector<128xf32>
    %79 = vector.multi_reduction <add>, %78, %cst_28 [0] : vector<32x128xf32> to vector<128xf32>
    %80 = vector.shape_cast %79 : vector<128xf32> to vector<1x128xf32>
    %81 = arith.mulf %78, %78 : vector<32x128xf32>
    %cst_29 = arith.constant dense<0.000000e+00> : vector<128xf32>
    %82 = vector.multi_reduction <add>, %81, %cst_29 [0] : vector<32x128xf32> to vector<128xf32>
    %83 = vector.shape_cast %82 : vector<128xf32> to vector<1x128xf32>
    %84 = tpu.concatenate %80, %83 in 0 : vector<1x128xf32>, vector<1x128xf32> -> vector<2x128xf32>
    %c8_i32_30 = arith.constant 8 : i32
    %85 = tpu.dynamic_rotate %84 by %c8_i32_30 dim 1 : vector<2x128xf32>, i32 -> vector<2x128xf32>
    %86 = arith.addf %84, %85 : vector<2x128xf32>
    %c16_i32_31 = arith.constant 16 : i32
    %87 = tpu.dynamic_rotate %86 by %c16_i32_31 dim 1 : vector<2x128xf32>, i32 -> vector<2x128xf32>
    %88 = arith.addf %86, %87 : vector<2x128xf32>
    %c32_i32_32 = arith.constant 32 : i32
    %89 = tpu.dynamic_rotate %88 by %c32_i32_32 dim 1 : vector<2x128xf32>, i32 -> vector<2x128xf32>
    %90 = arith.addf %88, %89 : vector<2x128xf32>
    %c64_i32_33 = arith.constant 64 : i32
    %91 = tpu.dynamic_rotate %90 by %c64_i32_33 dim 1 : vector<2x128xf32>, i32 -> vector<2x128xf32>
    %92 = arith.addf %90, %91 : vector<2x128xf32>
    %cst_34 = arith.constant 0.001953125 : f32
    %93 = vector.broadcast %cst_34 : f32 to vector<2x128xf32>
    %94 = arith.mulf %92, %93 : vector<2x128xf32>
    %95 = vector.extract_strided_slice %94 {offsets = [0, 0], sizes = [1, 128], strides = [1, 1]} : vector<2x128xf32> to vector<1x128xf32>
    %96 = vector.extract_strided_slice %94 {offsets = [1, 0], sizes = [1, 128], strides = [1, 1]} : vector<2x128xf32> to vector<1x128xf32>
    %97 = arith.mulf %95, %95 : vector<1x128xf32>
    %98 = arith.subf %96, %97 : vector<1x128xf32>
    %cst_35 = arith.constant 9.99999974E-6 : f32
    %99 = vector.broadcast %cst_35 : f32 to vector<1x128xf32>
    %100 = arith.addf %98, %99 : vector<1x128xf32>
    %101 = math.rsqrt %100 : vector<1x128xf32>
    %102 = arith.mulf %23, %101 : vector<1x128xf32>
    %103 = vector.broadcast %102 : vector<1x128xf32> to vector<32x128xf32>
    %104 = arith.mulf %78, %103 : vector<32x128xf32>
    %105 = arith.mulf %95, %102 : vector<1x128xf32>
    %106 = arith.subf %24, %105 : vector<1x128xf32>
    %107 = vector.broadcast %106 : vector<1x128xf32> to vector<32x128xf32>
    %108 = arith.addf %104, %107 : vector<32x128xf32>
    %cst_36 = arith.constant 0.000000e+00 : f32
    %109 = vector.broadcast %cst_36 : f32 to vector<32x128xf32>
    %110 = arith.maximumf %108, %109 : vector<32x128xf32>
    %111 = arith.truncf %110 : vector<32x128xf32> to vector<32x128xbf16>
    %c16_37 = arith.constant 16 : index
    %c0_38 = arith.constant 0 : index
    %112 = vector.load %arg6[%c16_37, %c0_38] : memref<64x128xbf16, #tpu.memory_space<vmem>>, vector<32x128xbf16>
    tpu.vector_store %arg6[%c16_37, %c0_38], %111 {strides = array<i32>} : memref<64x128xbf16, #tpu.memory_space<vmem>>, vector<32x128xbf16>,
    %c15_39 = arith.constant 15 : index
    %c0_40 = arith.constant 0 : index
    %113 = vector.load %arg6[%c15_39, %c0_40] : memref<64x128xbf16, #tpu.memory_space<vmem>>, vector<32x128xbf16>
    %c0_i32_41 = arith.constant 0 : i32
    %114 = arith.sitofp %c0_i32_41 : i32 to bf16
    %115 = vector.shape_cast %18 : vector<32x1xi1> to vector<32x1xi1>
    %116 = vector.broadcast %115 : vector<32x1xi1> to vector<32x128xi1>
    %117 = vector.broadcast %114 : bf16 to vector<32x128xbf16>
    %118 = arith.select %116, %113, %117 : vector<32x128xi1>, vector<32x128xbf16>
    %c17_42 = arith.constant 17 : index
    %c0_43 = arith.constant 0 : index
    %119 = vector.load %arg6[%c17_42, %c0_43] : memref<64x128xbf16, #tpu.memory_space<vmem>>, vector<32x128xbf16>
    %c0_i32_44 = arith.constant 0 : i32
    %120 = arith.sitofp %c0_i32_44 : i32 to bf16
    %121 = vector.shape_cast %20 : vector<32x1xi1> to vector<32x1xi1>
    %122 = vector.broadcast %121 : vector<32x1xi1> to vector<32x128xi1>
    %123 = vector.broadcast %120 : bf16 to vector<32x128xbf16>
    %124 = arith.select %122, %119, %123 : vector<32x128xi1>, vector<32x128xbf16>
    %125 = tpu.concatenate %118, %111, %124 in 1 : vector<32x128xbf16>, vector<32x128xbf16>, vector<32x128xbf16> -> vector<32x384xbf16>
    %c0_45 = arith.constant 0 : index
    %c0_46 = arith.constant 0 : index
    %126 = vector.load %arg3[%c0_45, %c0_46] : memref<384x128xbf16, #tpu.memory_space<vmem>>, vector<384x128xbf16>
    %cst_47 = arith.constant dense<0.000000e+00> : vector<32x128xf32>
    %127 = tpu.matmul %125, %126, %cst_47 {dimension_numbers = #tpu.dot_dimension_numbers<[1], [0], [0], [1], [0, 0, 1, 1], [], []>} : vector<32x384xbf16>, vector<384x128xbf16>, vector<32x128xf32> -> vector<32x128xf32>
    %cst_48 = arith.constant dense<0.000000e+00> : vector<128xf32>
    %128 = vector.multi_reduction <add>, %127, %cst_48 [0] : vector<32x128xf32> to vector<128xf32>
    %129 = vector.shape_cast %128 : vector<128xf32> to vector<1x128xf32>
    %130 = arith.mulf %127, %127 : vector<32x128xf32>
    %cst_49 = arith.constant dense<0.000000e+00> : vector<128xf32>
    %131 = vector.multi_reduction <add>, %130, %cst_49 [0] : vector<32x128xf32> to vector<128xf32>
    %132 = vector.shape_cast %131 : vector<128xf32> to vector<1x128xf32>
    %133 = tpu.concatenate %129, %132 in 0 : vector<1x128xf32>, vector<1x128xf32> -> vector<2x128xf32>
    %c8_i32_50 = arith.constant 8 : i32
    %134 = tpu.dynamic_rotate %133 by %c8_i32_50 dim 1 : vector<2x128xf32>, i32 -> vector<2x128xf32>
    %135 = arith.addf %133, %134 : vector<2x128xf32>
    %c16_i32_51 = arith.constant 16 : i32
    %136 = tpu.dynamic_rotate %135 by %c16_i32_51 dim 1 : vector<2x128xf32>, i32 -> vector<2x128xf32>
    %137 = arith.addf %135, %136 : vector<2x128xf32>
    %c32_i32_52 = arith.constant 32 : i32
    %138 = tpu.dynamic_rotate %137 by %c32_i32_52 dim 1 : vector<2x128xf32>, i32 -> vector<2x128xf32>
    %139 = arith.addf %137, %138 : vector<2x128xf32>
    %c64_i32_53 = arith.constant 64 : i32
    %140 = tpu.dynamic_rotate %139 by %c64_i32_53 dim 1 : vector<2x128xf32>, i32 -> vector<2x128xf32>
    %141 = arith.addf %139, %140 : vector<2x128xf32>
    %cst_54 = arith.constant 0.001953125 : f32
    %142 = vector.broadcast %cst_54 : f32 to vector<2x128xf32>
    %143 = arith.mulf %141, %142 : vector<2x128xf32>
    %144 = vector.extract_strided_slice %143 {offsets = [0, 0], sizes = [1, 128], strides = [1, 1]} : vector<2x128xf32> to vector<1x128xf32>
    %145 = vector.extract_strided_slice %143 {offsets = [1, 0], sizes = [1, 128], strides = [1, 1]} : vector<2x128xf32> to vector<1x128xf32>
    %146 = arith.mulf %144, %144 : vector<1x128xf32>
    %147 = arith.subf %145, %146 : vector<1x128xf32>
    %cst_55 = arith.constant 9.99999974E-6 : f32
    %148 = vector.broadcast %cst_55 : f32 to vector<1x128xf32>
    %149 = arith.addf %147, %148 : vector<1x128xf32>
    %150 = math.rsqrt %149 : vector<1x128xf32>
    %151 = arith.mulf %25, %150 : vector<1x128xf32>
    %152 = vector.broadcast %151 : vector<1x128xf32> to vector<32x128xf32>
    %153 = arith.mulf %127, %152 : vector<32x128xf32>
    %154 = arith.mulf %144, %151 : vector<1x128xf32>
    %155 = arith.subf %26, %154 : vector<1x128xf32>
    %156 = vector.broadcast %155 : vector<1x128xf32> to vector<32x128xf32>
    %157 = arith.addf %153, %156 : vector<32x128xf32>
    %158 = arith.addf %157, %61 : vector<32x128xf32>
    %cst_56 = arith.constant 0.000000e+00 : f32
    %159 = vector.broadcast %cst_56 : f32 to vector<32x128xf32>
    %160 = arith.maximumf %158, %159 : vector<32x128xf32>
    %c0_57 = arith.constant 0 : index
    %c0_58 = arith.constant 0 : index
    %161 = vector.load %arg5[%c0_57, %c0_58] : memref<32x128xf32, #tpu.memory_space<vmem>>, vector<32x128xf32>
    tpu.vector_store %arg5[%c0_57, %c0_58], %160 {strides = array<i32>} : memref<32x128xf32, #tpu.memory_space<vmem>>, vector<32x128xf32>,
    return
  }
}

</mosaic_0001>

<bundles_post_ra>
// kernel: resconv2d_forward.1
= control target key start
LH: loop header
LB: loop body
LE: loop exit
PB: predicated region body
PF: predicated region fallthrough
CT: control target
= control target key end

     0   :  { %vm136_vm0 = vcmask 523264   ;;  %vm214_vm1 = vcmask 1040384   ;;  %s1547_s30 = smov 32   ;;  %s1548_s6 = smov 64   ;;  %v23_v63 = vlaneseq  ;;  %vm1549_vm6 = vmmov 1   ;;  %s1940_s1 = inlined_call_operand.vmem [shape: bf16[64,128], index: 1, kind: input, shape index: {}]   ;;  %s1941_s0 = inlined_call_operand.vmem [shape: bf16[32,64], index: 0, kind: input, shape index: {}]   ;;  %s1942_s2 = inlined_call_operand.vmem [shape: bf16[384,128], index: 2, kind: input, shape index: {}]   ;;  %s1943_s4 = inlined_call_operand.vmem [shape: f32[6,128], index: 4, kind: input, shape index: {}]   ;;  %s1944_s3 = inlined_call_operand.vmem [shape: bf16[384,128], index: 3, kind: input, shape index: {}]   ;;  %s1945_s5 = inlined_call_operand.vmem [shape: f32[32,128], index: 5, kind: output, shape index: {}]  }
   0x1   :  { %v1485_v0 = vld [vmem:[%s1940_s1] sm:$0xff]   ;;  %v1486_v1 = vld [vmem:[%s1940_s1 + $0x8] sm:$0xff]   ;;  %v1487_v2 = vld [vmem:[%s1940_s1 + $0x10] sm:$0xff]   ;;  %vm291_vm12 = vsmask.f32 7424 }
   0x2   :  { %1427 = vmatprep.subr.bf16.mxu0 %v1485_v0  ;;  %v1489_v3 = vld [vmem:[%s1941_s0] sm:$0xff]   ;;  %v1488_v4 = vld [vmem:[%s1940_s1 + $0x18] sm:$0xff]   ;;  %v1490_v5 = vld [vmem:[%s1941_s0 + $0x8] sm:$0xff]   ;;  %s1545_s0 = smov 8   ;;  %s1546_s1 = smov 16  }
   0x3   :  { %1428 = vmatpush3.bf16.msra.mxu0 %v1485_v0  ;;  %1435 = vmatprep.mubr.msk.bf16.mxu0 %vm136_vm0, %v1489_v3  ;;  %v1494_v39 = vld [vmem:[%s1942_s2 + $0x80] sm:$0xff]   ;;  %v1497_v42 = vld [vmem:[%s1942_s2 + $0x88] sm:$0xff]   ;;  %v1500_v45 = vld [vmem:[%s1942_s2 + $0x90] sm:$0xff]   ;;  %v24_v0 = vshrl.u32 %v23_v63, 7  ;;  %vm338_vm13 = vsmask.f32 256 }
   0x4   :  { %1429 = vmatprep.subr.bf16.mxu0 %v1486_v1  ;;  %v1491_v40 = vld [vmem:[%s1942_s2 + $0x40] sm:$0xff]   ;;  %v1493_v43 = vld [vmem:[%s1942_s2 + $0x48] sm:$0xff]   ;;  %v1496_v46 = vld [vmem:[%s1942_s2 + $0x50] sm:$0xff]  }
   0x5   :  { %v1492_v41 = vld [vmem:[%s1942_s2] sm:$0xff]   ;;  %1351 = vmatprep.subr.bf16.mxu1 %v1491_v40  ;;  %v1495_v44 = vld [vmem:[%s1942_s2 + $0x8] sm:$0xff]   ;;  %v1498_v47 = vld [vmem:[%s1942_s2 + $0x10] sm:$0xff]   ;;  %v27_v3 = vadd.s32 24, %v24_v0 }
   0x6   :  { %1352 = vmatpush3.bf16.msra.mxu1 %v1492_v41  ;;  %v1503_v48 = vld [vmem:[%s1942_s2 + $0x98] sm:$0xff]   ;;  %v1506_v51 = vld [vmem:[%s1942_s2 + $0xa0] sm:$0xff]   ;;  %v1505_v54 = vld [vmem:[%s1942_s2 + $0x68] sm:$0xff]  }
   0x7   :  { %1430 = vmatpush3.bf16.msra.mxu0 %v1486_v1  ;;  %1353 = vmatprep.subr.bf16.mxu1 %v1493_v43  ;;  %v1499_v49 = vld [vmem:[%s1942_s2 + $0x58] sm:$0xff]   ;;  %v1502_v52 = vld [vmem:[%s1942_s2 + $0x60] sm:$0xff]   ;;  %v1509_v55 = vld [vmem:[%s1942_s2 + $0xa8] sm:$0xff]  }
   0x8   :  { %1431 = vmatprep.subr.bf16.mxu0 %v1487_v2  ;;  %v1501_v50 = vld [vmem:[%s1942_s2 + $0x18] sm:$0xff]   ;;  %v1504_v53 = vld [vmem:[%s1942_s2 + $0x20] sm:$0xff]   ;;  %v1507_v56 = vld [vmem:[%s1942_s2 + $0x28] sm:$0xff]  }
   0x9   :  { %v1512_v57 = vld [vmem:[%s1942_s2 + $0xb0] sm:$0xff]   ;;  %v1511_v60 = vld [vmem:[%s1942_s2 + $0x78] sm:$0xff]   ;;  %vm278_vm7 = vmpackc.low %vm1549_vm6, %vm1549_vm6 }
   0xa   :  { %1354 = vmatpush3.bf16.msra.mxu1 %v1495_v44  ;;  %v1508_v58 = vld [vmem:[%s1942_s2 + $0x70] sm:$0xff]   ;;  %v1514_v61 = vld [vmem:[%s1942_s2 + $0xb8] sm:$0xff]   ;;  %v85_v40 = vld [vmem:[%s1943_s4 + $0x1] sm:$0x1] }
   0xb   :  { %1432 = vmatpush3.bf16.msra.mxu0 %v1487_v2  ;;  %1355 = vmatprep.subr.bf16.mxu1 %v1496_v46  ;;  %v1510_v59 = vld [vmem:[%s1942_s2 + $0x30] sm:$0xff]   ;;  %v1513_v62 = vld [vmem:[%s1942_s2 + $0x38] sm:$0xff]  }
   0xc   :  { %1433 = vmatprep.subr.bf16.mxu0 %v1488_v4 }
   0xe   :  { %1356 = vmatpush3.bf16.msra.mxu1 %v1498_v47 }
   0xf   :  { %1434 = vmatpush3.bf16.msra.mxu0 %v1488_v4  ;;  %1357 = vmatprep.subr.bf16.mxu1 %v1499_v49 }
  0x10   :  { %1439 = vmatprep.subr.bf16.mxu0 %v1494_v39 }
  0x12   :  { %1436 = vmatmul.mubr.msk.bf16.vlgmr.msra.gmra.mrb[0].mxu0 %vm136_vm0, %v1490_v5  ;;  %1358 = vmatpush3.bf16.msra.mxu1 %v1501_v50  ;;  %v26_v5 = vadd.s32 16, %v24_v0 }
  0x13   :  { %1440 = vmatpush3.bf16.msra.mxu0 %v1494_v39  ;;  %1359 = vmatprep.subr.bf16.mxu1 %v1502_v52 }
  0x14   :  { %1441 = vmatprep.subr.bf16.mxu0 %v1497_v42 }
  0x16   :  { %1360 = vmatpush3.bf16.msra.mxu1 %v1504_v53 }
  0x17   :  { %1442 = vmatpush3.bf16.msra.mxu0 %v1497_v42  ;;  %1361 = vmatprep.subr.bf16.mxu1 %v1505_v54 }
  0x18   :  { %1443 = vmatprep.subr.bf16.mxu0 %v1500_v45 }
  0x1a   :  { %1362 = vmatpush3.bf16.msra.mxu1 %v1507_v56 }
  0x1b   :  { %1444 = vmatpush3.bf16.msra.mxu0 %v1500_v45  ;;  %1363 = vmatprep.subr.bf16.mxu1 %v1508_v58 }
  0x1c   :  { %1445 = vmatprep.subr.bf16.mxu0 %v1503_v48 }
  0x1e   :  { %1364 = vmatpush3.bf16.msra.mxu1 %v1510_v59 }
  0x1f   :  { %1446 = vmatpush3.bf16.msra.mxu0 %v1503_v48  ;;  %1365 = vmatprep.subr.bf16.mxu1 %v1511_v60  ;;  %v315_v60 = vld [vmem:[#allocation2 + $0x18] sm:$0x1] }
  0x20   :  { %1447 = vmatprep.subr.bf16.mxu0 %v1506_v51 }
  0x22   :  { %1366 = vmatpush3.bf16.msra.mxu1 %v1513_v62 }
  0x23   :  { %1448 = vmatpush3.bf16.msra.mxu0 %v1506_v51 }
  0x24   :  { %1449 = vmatprep.subr.bf16.mxu0 %v1509_v55 }
  0x27   :  { %1450 = vmatpush3.bf16.msra.mxu0 %v1509_v55 }
  0x28   :  { %1451 = vmatprep.subr.bf16.mxu0 %v1512_v57 }
  0x2b   :  { %1452 = vmatpush3.bf16.msra.mxu0 %v1512_v57 }
  0x2c   :  { %1453 = vmatprep.subr.bf16.mxu0 %v1514_v61 }
  0x2f   :  { %1454 = vmatpush3.bf16.msra.mxu0 %v1514_v61 }
  0xe5   :  { %v1599_v6 = vpop.f32.mrb[0].mxu0 }
  0xe6   :  { %v1601_v7 = vpop.f32.mrb[1].mxu0  ;;  %v203_v13 = vmul.f32 %v1599_v6, %v1599_v6 }
  0xe7   :  { %v1603_v8 = vpop.f32.mrb[2].mxu0  ;;  %v201_v10 = vmul.f32 %v1601_v7, %v1601_v7 }
  0xe8   :  { %v1605_v9 = vpop.f32.mrb[3].mxu0  ;;  %v204_v16 = vmul.f32 %v1603_v8, %v1603_v8 }
  0xe9   :  { %v192_v11 = vadd.f32 %v1605_v9, %v1601_v7  ;;  %v202_v12 = vmul.f32 %v1605_v9, %v1605_v9 }
  0xeb   :  { %v193_v14 = vadd.f32 %v1599_v6, %v192_v11  ;;  %v205_v15 = vadd.f32 %v202_v12, %v201_v10  ;;  %v32_v10 = vand.u32 15, %v24_v0  ;;  %v25_v11 = vadd.s32 8, %v24_v0 }
  0xed   :  { %v194_v17 = vadd.f32 %v1603_v8, %v193_v14  ;;  %v206_v18 = vadd.f32 %v205_v15, %v203_v13  ;;  %v53_v13 = vand.u32 15, %v27_v3  ;;  %v46_v15 = vand.u32 15, %v26_v5 }
  0xee   :  { %vm76_vm2 = vcmp.ge.s32.totalorder %v32_v10, 1 }
  0xef   :  { %v195_v19 = vrot.slane %v194_v17, 4  ;;  %v207_v20 = vadd.f32 %v206_v18, %v204_v16  ;;  %v39_v16 = vand.u32 15, %v25_v11  ;;  %vm83_vm3 = vcmp.le.s32.totalorder %v53_v13, 14  ;;  %vm277_vm4 = vmpackc.low %vm76_vm2, %vm76_vm2 }
  0xf0   :  { %vm78_vm5 = vcmp.ge.s32.totalorder %v46_v15, 1  ;;  %vm327_vm9 = vmpackc.low %vm83_vm3, %vm83_vm3 }
  0xf1   :  { %v196_v21 = vadd.f32 %v195_v19, %v194_v17  ;;  %v208_v22 = vrot.slane %v207_v20, 4  ;;  %vm81_vm8 = vcmp.le.s32.totalorder %v39_v16, 14  ;;  %vm279_vm10 = vmpackc.low %vm78_vm5, %vm78_vm5  ;;  %v1550_v19 = vmov 0  }
  0xf2   :  { %vm325_vm11 = vmpackc.low %vm81_vm8, %vm81_vm8 }
  0xf3   :  { %v197_v23 = vrot.slane %v196_v21, 2  ;;  %v209_v24 = vadd.f32 %v208_v22, %v207_v20  ;;  %v281_v20 = vsel %vm277_vm4, 65537, %v1550_v19  ;;  %v331_v22 = vsel %vm327_vm9, 65537, %v1550_v19 }
  0xf4   :  { %vm378_vm4 = vcmask 1046528  }
  0xf5   :  { %v198_v25 = vadd.f32 %v197_v23, %v196_v21  ;;  %v210_v26 = vrot.slane %v209_v24, 2  ;;  %v282_v21 = vsel %vm278_vm7, 65537, %v1550_v19 }
  0xf6   :  { %v1293_v23 = vcombine.low %v281_v20, %v282_v21 }
  0xf7   :  { %v199_v27 = vrot.slane %v198_v25, 1  ;;  %v211_v28 = vadd.f32 %v210_v26, %v209_v24  ;;  %v283_v24 = vsel %vm279_vm10, 65537, %v1550_v19  ;;  %v1296_v26 = vcombine.low %v282_v21, %v331_v22 }
  0xf9   :  { %v212_v29 = vrot.slane %v211_v28, 1  ;;  %v200_v30 = vadd.f32 %v199_v27, %v198_v25  ;;  %v329_v25 = vsel %vm325_vm11, 65537, %v1550_v19  ;;  %v1294_v27 = vcombine.low %v283_v24, %v282_v21 }
  0xfa   :  { %v350_v42 = vshll.u32 %v1296_v26, 16 }
  0xfb   :  { %v213_v31 = vadd.f32 %v212_v29, %v211_v28  ;;  %v293_v28 = vshll.u32 %v1293_v23, 16  ;;  %v1295_v29 = vcombine.low %v282_v21, %v329_v25 }
  0xfd   :  { %v215_v32 = vsel %vm214_vm1, %v200_v30, %v213_v31  ;;  %v84_v31 = vld [vmem:[%s1943_s4] sm:$0x1]  ;;  %v343_v48 = vshll.u32 %v1295_v29, 16 }
  0xfe   :  { %216 = vrot.lane.b32.xlu0 %v215_v32, %s1545_s0 }
 0x170   :  { %v217_v33 = vpop.permute.xlu0 %216 }
 0x171   :  { %v218_v34 = vadd.f32 %v217_v33, %v215_v32  ;;  %v347_v32 = vshrl.u32 %v1296_v26, 16  ;;  %v1703_v33 = vsub.s32 0, %v24_v0 }
 0x173   :  { %219 = vrot.lane.b32.xlu0 %v218_v34, %s1546_s1  ;;  %v1710_v41 = vrot.slane %v347_v32, 7 }
 0x175   :  { %v352_v51 = vor.u32 %v350_v42, %v1710_v41  ;;  %vm356_vm14 = vcmp.ne.s16.totalorder %v1710_v41, 0 }
 0x1e5   :  { %v220_v35 = vpop.permute.xlu0 %219 }
 0x1e6   :  { %v221_v36 = vadd.f32 %v220_v35, %v218_v34  ;;  %v1705_v35 = vrot.slane %v293_v28, 1 }
 0x1e8   :  { %222 = vrot.lane.b32.xlu1 %v221_v36, %s1547_s30  ;;  %vm307_vm15 = vcmp.ne.s16.totalorder %v1705_v35, 0 }
 0x25a   :  { %v223_v37 = vpop.permute.xlu1 %222 }
 0x25b   :  { %v1623_v38 = vadd.f32 %v223_v37, %v221_v36  ;;  %v296_v36 = vshrl.u32 %v1293_v23, 16  ;;  %v300_v37 = vshll.u32 %v1294_v27, 16 }
 0x25d   :  { %225 = vrot.lane.b32.xlu1 %v1623_v38, %s1548_s6  ;;  %v298_v45 = vor.u32 %v296_v36, %v1705_v35  ;;  %v302_v46 = vrot.slane %v300_v37, 1 }
 0x25f   :  { %v1721_v56 = vsel %vm291_vm12, %v298_v45, %v302_v46 }
 0x260   :  { %vm308_vm0 = vcmp.ne.s16.totalorder %v1721_v56, 0 }
 0x2cf   :  { %v226_v1 = vpop.permute.xlu1 %225 }
 0x2d0   :  { %v227_v2 = vadd.f32 %v226_v1, %v1623_v38  ;;  %v340_v38 = vshrl.u32 %v1295_v29, 16  ;;  %v266_v1 = vld [vmem:[#allocation2] sm:$0x80] }
 0x2d1   :  { %v310_v5 = vsel %vm307_vm15, %v266_v1, 0 }
 0x2d2   :  { %v228_v4 = vmul.f32 0.001953125, %v227_v2  ;;  %v342_v47 = vrot.slane %v340_v38, 7  ;;  %v359_v2 = vsel %vm356_vm14, %v315_v60, 0  ;;  %v433_v23 = vshrl.u32 %v310_v5, 16 }
 0x2d4   :  { %v229_v12 = vmul.f32 %v228_v4, %v228_v4  ;;  %v1723_v57 = vor.u32 %v343_v48, %v342_v47  ;;  %v435_v38 = vrot.slane %v433_v23, 7 }
 0x2d6   :  { %v231_v14 = vrot.slane %v229_v12, 7  ;;  %vm354_vm2 = vcmp.ne.s16.totalorder %v1723_v57, 0 }
 0x2d8   :  { %v233_v17 = vsub.f32 %v228_v4, %v231_v14  ;;  %v382_v14 = vrot.slane %v359_v2, 1 }
 0x2da   :  { %v234_v18 = vadd.f32 1e-05, %v233_v17 }
 0x2dc   :  { %1539 = vrsqrt.f32 %v234_v18 }
 0x2e6   :  { %v1540_v30 = vpop.eup %1539 }
 0x2e7   :  { %v237_v34 = vrot.slane %v1540_v30, 1 }
 0x2e9   :  { %v239_v39 = vmul.f32 %v237_v34, %v84_v31 }
 0x2eb   :  { %v243_v43 = vrot.slane %v239_v39, %v1703_v33  ;;  %v248_v44 = vmul.f32 %v239_v39, %v228_v4 }
 0x2ed   :  { %v249_v49 = vsub.f32 %v85_v40, %v248_v44  ;;  %v246_v50 = vmul.f32 %v1599_v6, %v243_v43  ;;  %v247_v52 = vmul.f32 %v1603_v8, %v243_v43  ;;  %v244_v54 = vmul.f32 %v243_v43, %v1601_v7 }
 0x2ee   :  { %v245_v55 = vmul.f32 %v243_v43, %v1605_v9  ;;  %v1736_v7 = vsel %vm338_vm13, %v342_v47, %v352_v51  ;;  %v304_v9 = vshrl.u32 %v1294_v27, 16 }
 0x2ef   :  { %v253_v53 = vrot.slane %v249_v49, %v1703_v33  ;;  %vm355_vm3 = vcmp.ne.s16.totalorder %v1736_v7, 0 }
 0x2f0   :  { %v1757_v10 = vor.u32 %v304_v9, %v302_v46 }
 0x2f1   :  { %v1726_v58 = vadd.f32 %v253_v53, %v246_v50  ;;  %v1728_v6 = vadd.f32 %v253_v53, %v247_v52  ;;  %v1730_v59 = vadd.f32 %v253_v53, %v244_v54  ;;  %v1732_v8 = vadd.f32 %v253_v53, %v245_v55 }
 0x2f2   :  { %vm309_vm5 = vcmp.ne.s16.totalorder %v1757_v10, 0 }
 0x2f3   :  { %v260_v61 = vmax.f32 %v1726_v58, 0.0  ;;  %v261_v62 = vmax.f32 %v1728_v6, 0.0  ;;  %v258_v63 = vmax.f32 %v1730_v59, 0.0  ;;  %v259_v0 = vmax.f32 %v1732_v8, 0.0 }
 0x2f5   :  { %v262_v3 = vpack.c.bf16 %v259_v0, %v258_v63  ;;  %v263_v4 = vpack.c.bf16 %v261_v62, %v260_v61 }
 0x2f7   :  { %v361_v11 = vshll.u32 %v262_v3, 16  ;;  %v368_v12 = vshll.u32 %v263_v4, 16  ;;  %v311_v13 = vsel %vm308_vm0, %v262_v3, 0  ;;  %v364_v15 = vshrl.u32 %v262_v3, 16 }
 0x2f8   :  { %v437_v16 = vshrl.u32 %v311_v13, 16  ;;  %v372_v17 = vshrl.u32 %v263_v4, 16  ;;  %v357_v18 = vsel %vm354_vm2, %v262_v3, 0  ;;  %v358_v21 = vsel %vm355_vm3, %v263_v4, 0 }
 0x2f9   :  { %v363_v19 = vrot.slane %v361_v11, 1  ;;  %v370_v20 = vrot.slane %v368_v12, 1  ;;  %v379_v22 = vrot.slane %v357_v18, 1  ;;  %v380_v24 = vrot.slane %v358_v21, 1 }
 0x2fa   :  { %v439_v26 = vrot.slane %v437_v16, 7  ;;  %v440_v31 = vshll.u32 %v311_v13, 16  ;;  %v312_v34 = vsel %vm309_vm5, %v263_v4, 0 }
 0x2fb   :  { %v366_v25 = vor.u32 %v364_v15, %v363_v19  ;;  %v374_v27 = vor.u32 %v372_v17, %v370_v20  ;;  %v381_v28 = vsel %vm378_vm4, %v379_v22, %v380_v24  ;;  %v383_v29 = vsel %vm378_vm4, %v380_v24, %v382_v14 }
 0x2fc   :  { %v445_v36 = vshrl.u32 %v363_v19, 16  ;;  %v457_v39 = vshrl.u32 %v379_v22, 16  ;;  %v442_v40 = vor.u32 %v440_v31, %v439_v26  ;;  %v461_v43 = vshrl.u32 %v381_v28, 16 }
 0x2fd   :  { %v371_v30 = vsel %vm291_vm12, %v366_v25, %v370_v20  ;;  %v477_v32 = vshrl.u32 %v374_v27, 16  ;;  %v485_v44 = vshrl.u32 %v383_v29, 16  ;;  %v480_v47 = vshll.u32 %v374_v27, 16 }
 0x2fe   :  { %v449_v37 = vshrl.u32 %v371_v30, 16  ;;  %v452_v46 = vshll.u32 %v371_v30, 16  ;;  %v469_v48 = vshrl.u32 %v312_v34, 16  ;;  %v463_v49 = vrot.slane %v461_v43, 7 }
 0x2ff   :  { %v479_v42 = vrot.slane %v477_v32, 7  ;;  %v464_v50 = vshll.u32 %v381_v28, 16  ;;  %v487_v51 = vrot.slane %v485_v44, 7  ;;  %v488_v52 = vshll.u32 %v383_v29, 16 }
 0x300   :  { %v451_v45 = vrot.slane %v449_v37, 7  ;;  %v447_v53 = vrot.slane %v445_v36, 7  ;;  %v459_v60 = vrot.slane %v457_v39, 7  ;;  %v443_v3 = vsel %vm338_vm13, %v435_v38, %v442_v40 }
 0x301   :  { %v482_v55 = vor.u32 %v480_v47, %v479_v42  ;;  %v466_v9 = vor.u32 %v464_v50, %v463_v49  ;;  %v490_v1 = vor.u32 %v488_v52, %v487_v51  ;;  %v471_v11 = vrot.slane %v469_v48, 7 }
 0x302   :  { %v454_v54 = vor.u32 %v452_v46, %v451_v45  ;;  %v472_v13 = vshll.u32 %v312_v34, 16 }
 0x303   :  { %v467_v4 = vsel %vm338_vm13, %v459_v60, %v466_v9  ;;  %v491_v5 = vsel %vm338_vm13, %v463_v49, %v490_v1  ;;  %v483_v12 = vsel %vm338_vm13, %v451_v45, %v482_v55 }
 0x304   :  { %v455_v2 = vsel %vm338_vm13, %v447_v53, %v454_v54  ;;  %1455 = vmatprep.mubr.bf16.mxu0 %v467_v4  ;;  %v474_v14 = vor.u32 %v472_v13, %v471_v11 }
 0x305   :  { %674 = vmatprep.mubr.bf16.mxu1 %v455_v2  ;;  %1456 = vmatmul.mubr.bf16.vlgmr.msra.gmra.mrb[4].mxu0 %v491_v5 }
 0x306   :  { %675 = vmatmul.mubr.bf16.vlgmr.msra.gmra.mrb[0].mxu1 %v443_v3  ;;  %v475_v15 = vsel %vm338_vm13, %v439_v26, %v474_v14 }
 0x307   :  { %682 = vmatprep.mubr.bf16.mxu1 %v483_v12 }
 0x30e   :  { %683 = vmatmul.mubr.bf16.gmra.mrb[4].mxu1 %v475_v15 }
 0x3d8   :  { %v1457_v18 = vpop.f32.mrb[4].mxu0 }
 0x3d9   :  { %v1367_v16 = vpop.f32.mrb[0].mxu1  ;;  %v725_v21 = vpop.f32.mrb[5].mxu0 }
 0x3da   :  { %v1368_v17 = vpop.f32.mrb[1].mxu1  ;;  %v1458_v23 = vpop.f32.mrb[6].mxu0 }
 0x3db   :  { %v1369_v19 = vadd.f32 %v1368_v17, %v1367_v16  ;;  %v1370_v20 = vpop.f32.mrb[2].mxu1  ;;  %v728_v27 = vpop.f32.mrb[7].mxu0  ;;  %v1518_v16 = vld [vmem:[%s1944_s3 + $0x80] sm:$0xff]  }
 0x3dc   :  { %v1371_v22 = vpop.f32.mrb[3].mxu1  ;;  %v1515_v17 = vld [vmem:[%s1944_s3 + $0x40] sm:$0xff]   ;;  %1459 = vmatprep.subr.bf16.mxu0 %v1518_v16 }
 0x3dd   :  { %v1372_v24 = vadd.f32 %v1371_v22, %v1370_v20  ;;  %v1777_v25 = vadd.f32 %v1369_v19, %v725_v21  ;;  %1389 = vmatprep.subr.bf16.mxu1 %v1515_v17  ;;  %1460 = vmatpush3.bf16.msra.mxu0 %v1518_v16  ;;  %v1521_v19 = vld [vmem:[%s1944_s3 + $0x88] sm:$0xff]   ;;  %v1524_v22 = vld [vmem:[%s1944_s3 + $0x90] sm:$0xff]  }
 0x3de   :  { %v1517_v20 = vld [vmem:[%s1944_s3 + $0x48] sm:$0xff]   ;;  %1461 = vmatprep.subr.bf16.mxu0 %v1521_v19 }
 0x3df   :  { %v1779_v28 = vadd.f32 %v1372_v24, %v728_v27  ;;  %v749_v36 = vmul.f32 %v1777_v25, %v1777_v25  ;;  %v1519_v21 = vld [vmem:[%s1944_s3 + $0x8] sm:$0xff]   ;;  %v1522_v24 = vld [vmem:[%s1944_s3 + $0x10] sm:$0xff]   ;;  %v1523_v27 = vld [vmem:[%s1944_s3 + $0x58] sm:$0xff]  }
 0x3e1   :  { %v1373_v29 = vpop.f32.mrb[4].mxu1  ;;  %v750_v26 = vmul.f32 %v1779_v28, %v1779_v28  ;;  %v740_v37 = vadd.f32 %v1779_v28, %v1777_v25  ;;  %1462 = vmatpush3.bf16.msra.mxu0 %v1521_v19  ;;  %v821_v19 = vld [vmem:[#allocation2 + $0x18] sm:$0x1] }
 0x3e2   :  { %v1374_v30 = vpop.f32.mrb[5].mxu1  ;;  %1463 = vmatprep.subr.bf16.mxu0 %v1524_v22 }
 0x3e3   :  { %v1375_v31 = vadd.f32 %v1374_v30, %v1373_v29  ;;  %v1376_v32 = vpop.f32.mrb[6].mxu1  ;;  %v753_v40 = vadd.f32 %v750_v26, %v749_v36  ;;  %v1527_v29 = vld [vmem:[%s1944_s3 + $0x98] sm:$0xff]   ;;  %v1526_v26 = vld [vmem:[%s1944_s3 + $0x60] sm:$0xff]   ;;  %v1529_v36 = vld [vmem:[%s1944_s3 + $0x68] sm:$0xff]  }
 0x3e4   :  { %v1377_v34 = vpop.f32.mrb[7].mxu1  ;;  %v1525_v30 = vld [vmem:[%s1944_s3 + $0x18] sm:$0xff]  }
 0x3e5   :  { %v1787_v38 = vadd.f32 %v1457_v18, %v1375_v31  ;;  %v1378_v39 = vadd.f32 %v1377_v34, %v1376_v32  ;;  %v1516_v18 = vld [vmem:[%s1944_s3] sm:$0xff]   ;;  %1464 = vmatpush3.bf16.msra.mxu0 %v1524_v22  ;;  %v1533_v34 = vld [vmem:[%s1944_s3 + $0xa8] sm:$0xff]  }
 0x3e6   :  { %1390 = vmatpush3.bf16.msra.mxu1 %v1516_v18  ;;  %1465 = vmatprep.subr.bf16.mxu0 %v1527_v29  ;;  %v1530_v31 = vld [vmem:[%s1944_s3 + $0xa0] sm:$0xff]  }
 0x3e7   :  { %v741_v42 = vadd.f32 %v740_v37, %v1787_v38  ;;  %v751_v43 = vmul.f32 %v1787_v38, %v1787_v38  ;;  %v1792_v44 = vadd.f32 %v1458_v23, %v1378_v39  ;;  %1391 = vmatprep.subr.bf16.mxu1 %v1517_v20  ;;  %v1520_v23 = vld [vmem:[%s1944_s3 + $0x50] sm:$0xff]   ;;  %v1528_v32 = vld [vmem:[%s1944_s3 + $0x20] sm:$0xff]   ;;  %v1531_v37 = vld [vmem:[%s1944_s3 + $0x28] sm:$0xff]  }
 0x3e8   :  { %v1536_v39 = vld [vmem:[%s1944_s3 + $0xb0] sm:$0xff]   ;;  %v813_v20 = vld [vmem:[#allocation2] sm:$0x80] }
 0x3e9   :  { %v754_v45 = vadd.f32 %v753_v40, %v751_v43  ;;  %v742_v46 = vadd.f32 %v741_v42, %v1792_v44  ;;  %v752_v47 = vmul.f32 %v1792_v44, %v1792_v44  ;;  %1466 = vmatpush3.bf16.msra.mxu0 %v1527_v29  ;;  %v1532_v40 = vld [vmem:[%s1944_s3 + $0x70] sm:$0xff]   ;;  %v1535_v43 = vld [vmem:[%s1944_s3 + $0x78] sm:$0xff]  }
 0x3ea   :  { %1392 = vmatpush3.bf16.msra.mxu1 %v1519_v21  ;;  %1467 = vmatprep.subr.bf16.mxu0 %v1530_v31  ;;  %v1534_v42 = vld [vmem:[%s1944_s3 + $0x30] sm:$0xff]  }
 0x3eb   :  { %v743_v48 = vrot.slane %v742_v46, 4  ;;  %v755_v49 = vadd.f32 %v754_v45, %v752_v47  ;;  %1393 = vmatprep.subr.bf16.mxu1 %v1520_v23  ;;  %v1538_v45 = vld [vmem:[%s1944_s3 + $0xb8] sm:$0xff]  }
 0x3ed   :  { %v744_v50 = vadd.f32 %v743_v48, %v742_v46  ;;  %v756_v51 = vrot.slane %v755_v49, 4  ;;  %1468 = vmatpush3.bf16.msra.mxu0 %v1530_v31  ;;  %v1537_v46 = vld [vmem:[%s1944_s3 + $0x38] sm:$0xff]  }
 0x3ee   :  { %1394 = vmatpush3.bf16.msra.mxu1 %v1522_v24  ;;  %1469 = vmatprep.subr.bf16.mxu0 %v1533_v34 }
 0x3ef   :  { %v745_v52 = vrot.slane %v744_v50, 2  ;;  %v757_v53 = vadd.f32 %v756_v51, %v755_v49  ;;  %1395 = vmatprep.subr.bf16.mxu1 %v1523_v27 }
 0x3f1   :  { %v746_v54 = vadd.f32 %v745_v52, %v744_v50  ;;  %v758_v55 = vrot.slane %v757_v53, 2  ;;  %1470 = vmatpush3.bf16.msra.mxu0 %v1533_v34 }
 0x3f2   :  { %1396 = vmatpush3.bf16.msra.mxu1 %v1525_v30  ;;  %1471 = vmatprep.subr.bf16.mxu0 %v1536_v39 }
 0x3f3   :  { %v747_v60 = vrot.slane %v746_v54, 1  ;;  %v759_v9 = vadd.f32 %v758_v55, %v757_v53  ;;  %1397 = vmatprep.subr.bf16.mxu1 %v1526_v26  ;;  %v86_v55 = vld [vmem:[%s1943_s4 + $0x2] sm:$0x1] }
 0x3f5   :  { %v760_v1 = vrot.slane %v759_v9, 1  ;;  %v748_v2 = vadd.f32 %v747_v60, %v746_v54  ;;  %1472 = vmatpush3.bf16.msra.mxu0 %v1536_v39 }
 0x3f6   :  { %1398 = vmatpush3.bf16.msra.mxu1 %v1528_v32  ;;  %1473 = vmatprep.subr.bf16.mxu0 %v1538_v45 }
 0x3f7   :  { %v761_v3 = vadd.f32 %v760_v1, %v759_v9  ;;  %1399 = vmatprep.subr.bf16.mxu1 %v1529_v36  ;;  %v87_v1 = vld [vmem:[%s1943_s4 + $0x3] sm:$0x1] }
 0x3f9   :  { %v762_v4 = vsel %vm214_vm1, %v748_v2, %v761_v3  ;;  %1474 = vmatpush3.bf16.msra.mxu0 %v1538_v45 }
 0x3fa   :  { %763 = vrot.lane.b32.xlu0 %v762_v4, %s1545_s0  ;;  %1400 = vmatpush3.bf16.msra.mxu1 %v1531_v37 }
 0x3fb   :  { %1401 = vmatprep.subr.bf16.mxu1 %v1532_v40 }
 0x3fe   :  { %1402 = vmatpush3.bf16.msra.mxu1 %v1534_v42 }
 0x3ff   :  { %1403 = vmatprep.subr.bf16.mxu1 %v1535_v43 }
 0x402   :  { %1404 = vmatpush3.bf16.msra.mxu1 %v1537_v46 }
 0x46c   :  { %v764_v5 = vpop.permute.xlu0 %763 }
 0x46d   :  { %v765_v11 = vadd.f32 %v764_v5, %v762_v4 }
 0x46f   :  { %766 = vrot.lane.b32.xlu1 %v765_v11, %s1546_s1 }
 0x4e1   :  { %v767_v12 = vpop.permute.xlu1 %766 }
 0x4e2   :  { %v768_v13 = vadd.f32 %v767_v12, %v765_v11 }
 0x4e4   :  { %769 = vrot.lane.b32.xlu0 %v768_v13, %s1547_s30 }
 0x556   :  { %v770_v14 = vpop.permute.xlu0 %769 }
 0x557   :  { %v771_v15 = vadd.f32 %v770_v14, %v768_v13 }
 0x559   :  { %772 = vrot.lane.b32.xlu1 %v771_v15, %s1548_s6 }
 0x5cb   :  { %v773_v47 = vpop.permute.xlu1 %772 }
 0x5cc   :  { %v774_v48 = vadd.f32 %v773_v47, %v771_v15 }
 0x5ce   :  { %v775_v49 = vmul.f32 0.001953125, %v774_v48 }
 0x5d0   :  { %v776_v50 = vmul.f32 %v775_v49, %v775_v49 }
 0x5d2   :  { %v778_v51 = vrot.slane %v776_v50, 7 }
 0x5d4   :  { %v780_v52 = vsub.f32 %v775_v49, %v778_v51 }
 0x5d6   :  { %v781_v53 = vadd.f32 1e-05, %v780_v52 }
 0x5d8   :  { %1541 = vrsqrt.f32 %v781_v53 }
 0x5e2   :  { %v1542_v54 = vpop.eup %1541 }
 0x5e3   :  { %v784_v60 = vrot.slane %v1542_v54, 1 }
 0x5e5   :  { %v786_v9 = vmul.f32 %v784_v60, %v86_v55 }
 0x5e7   :  { %v790_v2 = vrot.slane %v786_v9, %v1703_v33  ;;  %v795_v3 = vmul.f32 %v786_v9, %v775_v49 }
 0x5e9   :  { %v796_v4 = vsub.f32 %v87_v1, %v795_v3  ;;  %v791_v5 = vmul.f32 %v790_v2, %v1777_v25  ;;  %v792_v11 = vmul.f32 %v790_v2, %v1779_v28  ;;  %v793_v12 = vmul.f32 %v790_v2, %v1787_v38 }
 0x5ea   :  { %v794_v13 = vmul.f32 %v790_v2, %v1792_v44  ;;  %v824_v25 = vsel %vm356_vm14, %v821_v19, 0  ;;  %v816_v38 = vsel %vm307_vm15, %v813_v20, 0 }
 0x5eb   :  { %v800_v14 = vrot.slane %v796_v4, %v1703_v33  ;;  %v846_v26 = vrot.slane %v824_v25, 1  ;;  %v897_v35 = vshrl.u32 %v816_v38, 16 }
 0x5ed   :  { %v803_v15 = vadd.f32 %v800_v14, %v793_v12  ;;  %v804_v16 = vadd.f32 %v800_v14, %v794_v13  ;;  %v801_v17 = vadd.f32 %v800_v14, %v791_v5  ;;  %v802_v18 = vadd.f32 %v800_v14, %v792_v11 }
 0x5ee   :  { %v899_v51 = vrot.slane %v897_v35, 7 }
 0x5ef   :  { %v807_v21 = vmax.f32 %v803_v15, 0.0  ;;  %v808_v22 = vmax.f32 %v804_v16, 0.0  ;;  %v805_v23 = vmax.f32 %v801_v17, 0.0  ;;  %v806_v24 = vmax.f32 %v802_v18, 0.0 }
 0x5f1   :  { %v809_v28 = vpack.c.bf16 %v806_v24, %v805_v23  ;;  %v810_v27 = vpack.c.bf16 %v808_v22, %v807_v21 }
 0x5f3   :  { %v826_v44 = vshll.u32 %v809_v28, 16  ;;  %v833_v29 = vshll.u32 %v810_v27, 16  ;;  %v817_v30 = vsel %vm308_vm0, %v809_v28, 0  ;;  %v829_v31 = vshrl.u32 %v809_v28, 16 }
 0x5f4   :  { %v901_v32 = vshrl.u32 %v817_v30, 16  ;;  %v837_v34 = vshrl.u32 %v810_v27, 16  ;;  %v822_v36 = vsel %vm354_vm2, %v809_v28, 0  ;;  %v823_v39 = vsel %vm355_vm3, %v810_v27, 0 }
 0x5f5   :  { %v828_v37 = vrot.slane %v826_v44, 1  ;;  %v835_v41 = vrot.slane %v833_v29, 1  ;;  %v843_v40 = vrot.slane %v822_v36, 1  ;;  %v844_v42 = vrot.slane %v823_v39, 1 }
 0x5f6   :  { %v903_v45 = vrot.slane %v901_v32, 7  ;;  %v904_v49 = vshll.u32 %v817_v30, 16  ;;  %v818_v50 = vsel %vm309_vm5, %v810_v27, 0 }
 0x5f7   :  { %v831_v43 = vor.u32 %v829_v31, %v828_v37  ;;  %v839_v46 = vor.u32 %v837_v34, %v835_v41  ;;  %v845_v56 = vsel %vm378_vm4, %v843_v40, %v844_v42  ;;  %v847_v47 = vsel %vm378_vm4, %v844_v42, %v846_v26 }
 0x5f8   :  { %v909_v7 = vshrl.u32 %v828_v37, 16  ;;  %v921_v53 = vshrl.u32 %v843_v40, 16  ;;  %v906_v54 = vor.u32 %v904_v49, %v903_v45  ;;  %v925_v60 = vshrl.u32 %v845_v56, 16 }
 0x5f9   :  { %v836_v48 = vsel %vm291_vm12, %v831_v43, %v835_v41  ;;  %v941_v57 = vshrl.u32 %v839_v46, 16  ;;  %v949_v9 = vshrl.u32 %v847_v47, 16  ;;  %v944_v3 = vshll.u32 %v839_v46, 16 }
 0x5fa   :  { %v913_v52 = vshrl.u32 %v836_v48, 16  ;;  %v916_v2 = vshll.u32 %v836_v48, 16  ;;  %v933_v4 = vshrl.u32 %v818_v50, 16  ;;  %v927_v5 = vrot.slane %v925_v60, 7 }
 0x5fb   :  { %v943_v55 = vrot.slane %v941_v57, 7  ;;  %v928_v11 = vshll.u32 %v845_v56, 16  ;;  %v951_v12 = vrot.slane %v949_v9, 7  ;;  %v952_v13 = vshll.u32 %v847_v47, 16 }
 0x5fc   :  { %v915_v1 = vrot.slane %v913_v52, 7  ;;  %v911_v14 = vrot.slane %v909_v7, 7  ;;  %v923_v16 = vrot.slane %v921_v53, 7  ;;  %v907_v20 = vsel %vm338_vm13, %v899_v51, %v906_v54 }
 0x5fd   :  { %v946_v10 = vor.u32 %v944_v3, %v943_v55  ;;  %v930_v17 = vor.u32 %v928_v11, %v927_v5  ;;  %v954_v18 = vor.u32 %v952_v13, %v951_v12  ;;  %v935_v23 = vrot.slane %v933_v4, 7 }
 0x5fe   :  { %v918_v15 = vor.u32 %v916_v2, %v915_v1  ;;  %v936_v25 = vshll.u32 %v818_v50, 16 }
 0x5ff   :  { %v931_v21 = vsel %vm338_vm13, %v923_v16, %v930_v17  ;;  %v955_v22 = vsel %vm338_vm13, %v927_v5, %v954_v18  ;;  %v947_v24 = vsel %vm338_vm13, %v915_v1, %v946_v10 }
 0x600   :  { %v919_v19 = vsel %vm338_vm13, %v911_v14, %v918_v15  ;;  %1475 = vmatprep.mubr.bf16.mxu0 %v931_v21  ;;  %v938_v28 = vor.u32 %v936_v25, %v935_v23 }
 0x601   :  { %1138 = vmatprep.mubr.bf16.mxu1 %v919_v19  ;;  %1476 = vmatmul.mubr.bf16.vlgmr.msra.gmra.mrb[8].mxu0 %v955_v22 }
 0x602   :  { %1139 = vmatmul.mubr.bf16.vlgmr.msra.gmra.mrb[8].mxu1 %v907_v20  ;;  %v939_v27 = vsel %vm338_vm13, %v903_v45, %v938_v28 }
 0x603   :  { %1146 = vmatprep.mubr.bf16.mxu1 %v947_v24 }
 0x60a   :  { %1147 = vmatmul.mubr.bf16.gmra.mrb[12].mxu1 %v939_v27 }
 0x6d4   :  { %v1477_v29 = vpop.f32.mrb[8].mxu0 }
 0x6d5   :  { %v1405_v38 = vpop.f32.mrb[8].mxu1  ;;  %v1189_v31 = vpop.f32.mrb[9].mxu0 }
 0x6d6   :  { %v1406_v44 = vpop.f32.mrb[9].mxu1  ;;  %v1478_v34 = vpop.f32.mrb[10].mxu0 }
 0x6d7   :  { %v1407_v30 = vadd.f32 %v1406_v44, %v1405_v38  ;;  %v1408_v26 = vpop.f32.mrb[10].mxu1  ;;  %v1192_v41 = vpop.f32.mrb[11].mxu0 }
 0x6d8   :  { %v1409_v32 = vpop.f32.mrb[11].mxu1 }
 0x6d9   :  { %v1410_v36 = vadd.f32 %v1409_v32, %v1408_v26  ;;  %v1190_v37 = vadd.f32 %v1407_v30, %v1189_v31  ;;  %v89_v31 = vld [vmem:[%s1943_s4 + $0x5] sm:$0x1] }
 0x6db   :  { %v1193_v39 = vadd.f32 %v1410_v36, %v1192_v41  ;;  %v1213_v45 = vmul.f32 %v1190_v37, %v1190_v37 }
 0x6dd   :  { %v1411_v40 = vpop.f32.mrb[12].mxu1  ;;  %v1214_v42 = vmul.f32 %v1193_v39, %v1193_v39  ;;  %v1204_v47 = vadd.f32 %v1193_v39, %v1190_v37 }
 0x6de   :  { %v1412_v35 = vpop.f32.mrb[13].mxu1 }
 0x6df   :  { %v1413_v43 = vadd.f32 %v1412_v35, %v1411_v40  ;;  %v1414_v46 = vpop.f32.mrb[14].mxu1  ;;  %v1217_v57 = vadd.f32 %v1214_v42, %v1213_v45 }
 0x6e0   :  { %v1415_v56 = vpop.f32.mrb[15].mxu1 }
 0x6e1   :  { %v1198_v48 = vadd.f32 %v1477_v29, %v1413_v43  ;;  %v1416_v49 = vadd.f32 %v1415_v56, %v1414_v46  ;;  %v88_v29 = vld [vmem:[%s1943_s4 + $0x4] sm:$0x1] }
 0x6e3   :  { %v1205_v50 = vadd.f32 %v1204_v47, %v1198_v48  ;;  %v1215_v51 = vmul.f32 %v1198_v48, %v1198_v48  ;;  %v1201_v7 = vadd.f32 %v1478_v34, %v1416_v49 }
 0x6e5   :  { %v1218_v52 = vadd.f32 %v1217_v57, %v1215_v51  ;;  %v1206_v53 = vadd.f32 %v1205_v50, %v1201_v7  ;;  %v1216_v54 = vmul.f32 %v1201_v7, %v1201_v7 }
 0x6e7   :  { %v1207_v55 = vrot.slane %v1206_v53, 4  ;;  %v1219_v60 = vadd.f32 %v1218_v52, %v1216_v54 }
 0x6e9   :  { %v1208_v9 = vadd.f32 %v1207_v55, %v1206_v53  ;;  %v1220_v1 = vrot.slane %v1219_v60, 4 }
 0x6eb   :  { %v1209_v2 = vrot.slane %v1208_v9, 2  ;;  %v1221_v3 = vadd.f32 %v1220_v1, %v1219_v60 }
 0x6ed   :  { %v1210_v4 = vadd.f32 %v1209_v2, %v1208_v9  ;;  %v1222_v5 = vrot.slane %v1221_v3, 2 }
 0x6ef   :  { %v1211_v11 = vrot.slane %v1210_v4, 1  ;;  %v1223_v12 = vadd.f32 %v1222_v5, %v1221_v3 }
 0x6f1   :  { %v1224_v13 = vrot.slane %v1223_v12, 1  ;;  %v1212_v14 = vadd.f32 %v1211_v11, %v1210_v4 }
 0x6f3   :  { %v1225_v15 = vadd.f32 %v1224_v13, %v1223_v12 }
 0x6f5   :  { %v1226_v10 = vsel %vm214_vm1, %v1212_v14, %v1225_v15 }
 0x6f6   :  { %1227 = vrot.lane.b32.xlu0 %v1226_v10, %s1545_s0 }
 0x768   :  { %v1228_v16 = vpop.permute.xlu0 %1227 }
 0x769   :  { %v1229_v17 = vadd.f32 %v1228_v16, %v1226_v10 }
 0x76b   :  { %1230 = vrot.lane.b32.xlu1 %v1229_v17, %s1546_s1 }
 0x7dd   :  { %v1231_v18 = vpop.permute.xlu1 %1230 }
 0x7de   :  { %v1232_v19 = vadd.f32 %v1231_v18, %v1229_v17 }
 0x7e0   :  { %1233 = vrot.lane.b32.xlu0 %v1232_v19, %s1547_s30 }
 0x852   :  { %v1234_v20 = vpop.permute.xlu0 %1233 }
 0x853   :  { %v1235_v21 = vadd.f32 %v1234_v20, %v1232_v19 }
 0x855   :  { %1236 = vrot.lane.b32.xlu1 %v1235_v21, %s1548_s6 }
 0x8c7   :  { %v1237_v22 = vpop.permute.xlu1 %1236 }
 0x8c8   :  { %v1238_v23 = vadd.f32 %v1237_v22, %v1235_v21 }
 0x8ca   :  { %v1239_v24 = vmul.f32 0.001953125, %v1238_v23 }
 0x8cc   :  { %v1240_v25 = vmul.f32 %v1239_v24, %v1239_v24 }
 0x8ce   :  { %v1242_v28 = vrot.slane %v1240_v25, 7 }
 0x8d0   :  { %v1244_v27 = vsub.f32 %v1239_v24, %v1242_v28 }
 0x8d2   :  { %v1245_v38 = vadd.f32 1e-05, %v1244_v27 }
 0x8d4   :  { %1543 = vrsqrt.f32 %v1245_v38 }
 0x8de   :  { %v1544_v44 = vpop.eup %1543 }
 0x8df   :  { %v1248_v30 = vrot.slane %v1544_v44, 1 }
 0x8e1   :  { %v1250_v26 = vmul.f32 %v1248_v30, %v88_v29 }
 0x8e3   :  { %v1254_v32 = vrot.slane %v1250_v26, %v1703_v33  ;;  %v1259_v34 = vmul.f32 %v1250_v26, %v1239_v24 }
 0x8e5   :  { %v1260_v36 = vsub.f32 %v89_v31, %v1259_v34  ;;  %v1255_v41 = vmul.f32 %v1254_v32, %v1190_v37  ;;  %v1256_v40 = vmul.f32 %v1254_v32, %v1193_v39  ;;  %v1257_v35 = vmul.f32 %v1254_v32, %v1198_v48 }
 0x8e6   :  { %v1258_v42 = vmul.f32 %v1254_v32, %v1201_v7 }
 0x8e7   :  { %v1264_v43 = vrot.slane %v1260_v36, %v1703_v33 }
 0x8e9   :  { %v1265_v46 = vadd.f32 %v1264_v43, %v1255_v41  ;;  %v1266_v56 = vadd.f32 %v1264_v43, %v1256_v40  ;;  %v1267_v45 = vadd.f32 %v1264_v43, %v1257_v35  ;;  %v1268_v47 = vadd.f32 %v1264_v43, %v1258_v42 }
 0x8eb   :  { %v1269_v49 = vadd.f32 %v1265_v46, %v258_v63  ;;  %v1270_v57 = vadd.f32 %v1266_v56, %v259_v0  ;;  %v1271_v50 = vadd.f32 %v1267_v45, %v260_v61  ;;  %v1272_v37 = vadd.f32 %v1268_v47, %v261_v62 }
 0x8ed   :  { %v1273_v39 = vmax.f32 %v1269_v49, 0.0  ;;  %v1274_v48 = vmax.f32 %v1270_v57, 0.0  ;;  %v1275_v51 = vmax.f32 %v1271_v50, 0.0  ;;  %v1276_v33 = vmax.f32 %v1272_v37, 0.0 }
 0x8ef   :  { %1277 = vst [vmem:[%s1945_s5] sm:$0xff] %v1273_v39  ;;  %1278 = vst [vmem:[%s1945_s5 + $0x8] sm:$0xff] %v1274_v48 }
 0x8f0   :  { %1279 = vst [vmem:[%s1945_s5 + $0x10] sm:$0xff] %v1275_v51  ;;  %1280 = vst [vmem:[%s1945_s5 + $0x18] sm:$0xff] %v1276_v33 }

</bundles_post_ra>
